<compile_context>
chip_gen: v7x
topology: tpu7x:2x2x1
jax: 0.10.0
libtpu: 0.0.40
codegen_flags: <defaults>
</compile_context>

<pallas_src>
import jax
import jax.numpy as jnp
from jax.experimental import pallas as pl
from jax.experimental.pallas import tpu as pltpu


def _round_up(n, m):
    return ((n + m - 1) // m) * m


def _cdiv(a, b):
    return (a + b - 1) // b


def _simple_nn_kernel(x_ref, w1_ref, b1_ref, w2_ref, b2_ref, o_ref):
    # x_ref : (2, tr, W) VMEM  -- feature-major batch panel (batch on sublanes x lanes)
    # w1_ref: (4, 2)     SMEM  -- fc1.weight (PyTorch layout)
    # b1_ref: (4,)       SMEM  -- fc1.bias
    # w2_ref: (1, 4)     SMEM  -- fc2.weight
    # b2_ref: (1,)       SMEM  -- fc2.bias
    # o_ref : (tr, W)    VMEM  -- sigmoid(fc2(relu(fc1(x)))) for this panel
    x0 = x_ref[0]                      # (tr, W) dense tile, feature 0
    x1 = x_ref[1]                      # (tr, W) dense tile, feature 1

    # fc1 + ReLU + fc2 fused as statically-unrolled VPU FMAs; the hidden
    # activations are never materialized as a (4, tr, W) block.
    acc = None
    for j in range(4):
        h_j = w1_ref[j, 0] * x0 + w1_ref[j, 1] * x1 + b1_ref[j]
        h_j = jnp.maximum(h_j, 0.0)    # ReLU
        c_j = w2_ref[0, j] * h_j
        acc = c_j if acc is None else acc + c_j

    z = acc + b2_ref[0]                # fc2 bias added once at the end
    # Exact sigmoid via a single EUP tanh (EUP slot has slack; VALU stays free).
    o_ref[...] = (0.5 * jnp.tanh(0.5 * z) + 0.5).astype(o_ref.dtype)


def simple_nn_forward(x, w1, b1, w2, b2):
    """x: (B, 2) f32; w1: (4, 2); b1: (4,); w2: (1, 4); b2: (1,) — PyTorch shapes."""
    B = x.shape[0]

    # Panel geometry: W lanes (multiple of 128), R rows on the sublane axis.
    W = min(1024, _round_up(B, 128))
    b_pad = _round_up(B, W)            # pad only to panel width (<= W-1 extra)
    R = b_pad // W

    # Tile rows: tr*W*4B = 2 MiB planes max (input tile 4 MiB, output 2 MiB,
    # 12 MiB double-buffered -> fits every generation's scoped VMEM default).
    TR_MAX = 512
    if R <= 8:
        tr = R                                         # full (tiny) extent
    else:
        # multiple of 8; guarantees >= 2 grid steps so v7x's two TCs both work.
        tr = min(TR_MAX, _round_up(_cdiv(R, 2), 8))
    grid = _cdiv(R, tr)                                # last block may be partial

    # Layout plumbing: feature-major + pad to panel granularity, free reshape
    # into (2, R, W) panels.
    x_t = jnp.pad(x.T.astype(jnp.float32), ((0, 0), (0, b_pad - B)))
    x_p = x_t.reshape(2, R, W)

    out_p = pl.pallas_call(
        _simple_nn_kernel,
        out_shape=jax.ShapeDtypeStruct((R, W), jnp.float32),
        grid=(grid,),
        in_specs=[
            pl.BlockSpec((2, tr, W), lambda i: (0, i, 0)),          # x panel (VMEM, pipelined)
            pl.BlockSpec(memory_space=pltpu.MemorySpace.SMEM),      # w1 (4, 2)
            pl.BlockSpec(memory_space=pltpu.MemorySpace.SMEM),      # b1 (4,)
            pl.BlockSpec(memory_space=pltpu.MemorySpace.SMEM),      # w2 (1, 4)
            pl.BlockSpec(memory_space=pltpu.MemorySpace.SMEM),      # b2 (1,)
        ],
        out_specs=pl.BlockSpec((tr, W), lambda i: (i, 0)),
        compiler_params=pltpu.CompilerParams(
            dimension_semantics=("parallel",),                      # batch tiles across TCs
            vmem_limit_bytes=32 * 1024 * 1024,                      # headroom on all gens
        ),
    )(x_p, w1.astype(jnp.float32), b1.astype(jnp.float32),
      w2.astype(jnp.float32), b2.astype(jnp.float32))

    return out_p.reshape(b_pad)[:B].reshape(B, 1)


def _reference_forward(x, w1, b1, w2, b2):
    h = jnp.maximum(x @ w1.T + b1, 0.0)
    return jax.nn.sigmoid(h @ w2.T + b2)


if __name__ == "__main__":
    key = jax.random.PRNGKey(0)
    kx, k1, k2, k3, k4, kx2 = jax.random.split(key, 6)

    # Deterministic parameter init (shapes match nn.Linear(2,4) / nn.Linear(4,1)).
    bound1 = 1.0 / jnp.sqrt(2.0)
    bound2 = 1.0 / jnp.sqrt(4.0)
    w1 = jax.random.uniform(k1, (4, 2), jnp.float32, -bound1, bound1)
    b1 = jax.random.uniform(k2, (4,), jnp.float32, -bound1, bound1)
    w2 = jax.random.uniform(k3, (1, 4), jnp.float32, -bound2, bound2)
    b2 = jax.random.uniform(k4, (1,), jnp.float32, -bound2, bound2)

    # Small primary check (matches the module's tiny 2-feature input).
    B = 8
    x = jax.random.normal(kx, (B, 2), dtype=jnp.float32)
    out = jax.block_until_ready(simple_nn_forward(x, w1, b1, w2, b2))
    ref = _reference_forward(x, w1, b1, w2, b2)
    assert out.shape == (B, 1)
    assert jnp.allclose(out, ref, atol=1e-5, rtol=1e-5), float(jnp.max(jnp.abs(out - ref)))

    # Secondary check exercising multi-row panels, a 2-step grid and a partial
    # final block (B not a multiple of the panel width).
    B2 = 9223
    x2 = jax.random.normal(kx2, (B2, 2), dtype=jnp.float32)
    out2 = jax.block_until_ready(simple_nn_forward(x2, w1, b1, w2, b2))
    ref2 = _reference_forward(x2, w1, b1, w2, b2)
    assert out2.shape == (B2, 1)
    assert jnp.allclose(out2, ref2, atol=1e-5, rtol=1e-5), float(jnp.max(jnp.abs(out2 - ref2)))

    print("KERNEL_OK")
</pallas_src>

<mosaic_0001>
module attributes {stable_mosaic.version = 11 : i64} {
  func.func @_simple_nn_kernel(%arg0: i32, %arg1: memref<2x1x128xf32, #tpu.memory_space<vmem>>, %arg2: memref<4x2xf32, #tpu.memory_space<smem>>, %arg3: memref<4xf32, #tpu.memory_space<smem>>, %arg4: memref<1x4xf32, #tpu.memory_space<smem>>, %arg5: memref<1xf32, #tpu.memory_space<smem>>, %arg6: memref<1x128xf32, #tpu.memory_space<vmem>>) attributes {dimension_semantics = [#tpu.dimension_semantics<parallel>], iteration_bounds = array<i64: 1>, scalar_prefetch = 0 : i64, scratch_operands = 0 : i64, tpu.core_type = #tpu.core_type<tc>, window_params = [{transform_indices = @transform_0, window_bounds = array<i64: 2, 1, 128>}, {transform_indices = @transform_1, window_bounds = array<i64: 4, 2>}, {transform_indices = @transform_2, window_bounds = array<i64: 4>}, {transform_indices = @transform_3, window_bounds = array<i64: 1, 4>}, {transform_indices = @transform_4, window_bounds = array<i64: 1>}, {transform_indices = @transform_5, window_bounds = array<i64: 1, 128>}]} {
    %c0 = arith.constant 0 : index
    %c0_0 = arith.constant 0 : index
    %c0_1 = arith.constant 0 : index
    %0 = vector.load %arg1[%c0, %c0_0, %c0_1] : memref<2x1x128xf32, #tpu.memory_space<vmem>>, vector<1x1x128xf32>
    %1 = vector.shape_cast %0 : vector<1x1x128xf32> to vector<1x128xf32>
    %c1 = arith.constant 1 : index
    %c0_2 = arith.constant 0 : index
    %c0_3 = arith.constant 0 : index
    %2 = vector.load %arg1[%c1, %c0_2, %c0_3] : memref<2x1x128xf32, #tpu.memory_space<vmem>>, vector<1x1x128xf32>
    %3 = vector.shape_cast %2 : vector<1x1x128xf32> to vector<1x128xf32>
    %c0_4 = arith.constant 0 : index
    %c0_5 = arith.constant 0 : index
    %4 = memref.load %arg2[%c0_4, %c0_5] : memref<4x2xf32, #tpu.memory_space<smem>>
    %5 = vector.broadcast %4 : f32 to vector<1x128xf32>
    %6 = arith.mulf %5, %1 : vector<1x128xf32>
    %c0_6 = arith.constant 0 : index
    %c1_7 = arith.constant 1 : index
    %7 = memref.load %arg2[%c0_6, %c1_7] : memref<4x2xf32, #tpu.memory_space<smem>>
    %8 = vector.broadcast %7 : f32 to vector<1x128xf32>
    %9 = arith.mulf %8, %3 : vector<1x128xf32>
    %10 = arith.addf %6, %9 : vector<1x128xf32>
    %c0_8 = arith.constant 0 : index
    %11 = memref.load %arg3[%c0_8] : memref<4xf32, #tpu.memory_space<smem>>
    %12 = vector.broadcast %11 : f32 to vector<1x128xf32>
    %13 = arith.addf %10, %12 : vector<1x128xf32>
    %cst = arith.constant 0.000000e+00 : f32
    %14 = vector.broadcast %cst : f32 to vector<1x128xf32>
    %15 = arith.maximumf %13, %14 : vector<1x128xf32>
    %c0_9 = arith.constant 0 : index
    %c0_10 = arith.constant 0 : index
    %16 = memref.load %arg4[%c0_9, %c0_10] : memref<1x4xf32, #tpu.memory_space<smem>>
    %17 = vector.broadcast %16 : f32 to vector<1x128xf32>
    %18 = arith.mulf %17, %15 : vector<1x128xf32>
    %c1_11 = arith.constant 1 : index
    %c0_12 = arith.constant 0 : index
    %19 = memref.load %arg2[%c1_11, %c0_12] : memref<4x2xf32, #tpu.memory_space<smem>>
    %20 = vector.broadcast %19 : f32 to vector<1x128xf32>
    %21 = arith.mulf %20, %1 : vector<1x128xf32>
    %c1_13 = arith.constant 1 : index
    %c1_14 = arith.constant 1 : index
    %22 = memref.load %arg2[%c1_13, %c1_14] : memref<4x2xf32, #tpu.memory_space<smem>>
    %23 = vector.broadcast %22 : f32 to vector<1x128xf32>
    %24 = arith.mulf %23, %3 : vector<1x128xf32>
    %25 = arith.addf %21, %24 : vector<1x128xf32>
    %c1_15 = arith.constant 1 : index
    %26 = memref.load %arg3[%c1_15] : memref<4xf32, #tpu.memory_space<smem>>
    %27 = vector.broadcast %26 : f32 to vector<1x128xf32>
    %28 = arith.addf %25, %27 : vector<1x128xf32>
    %cst_16 = arith.constant 0.000000e+00 : f32
    %29 = vector.broadcast %cst_16 : f32 to vector<1x128xf32>
    %30 = arith.maximumf %28, %29 : vector<1x128xf32>
    %c0_17 = arith.constant 0 : index
    %c1_18 = arith.constant 1 : index
    %31 = memref.load %arg4[%c0_17, %c1_18] : memref<1x4xf32, #tpu.memory_space<smem>>
    %32 = vector.broadcast %31 : f32 to vector<1x128xf32>
    %33 = arith.mulf %32, %30 : vector<1x128xf32>
    %34 = arith.addf %18, %33 : vector<1x128xf32>
    %c2 = arith.constant 2 : index
    %c0_19 = arith.constant 0 : index
    %35 = memref.load %arg2[%c2, %c0_19] : memref<4x2xf32, #tpu.memory_space<smem>>
    %36 = vector.broadcast %35 : f32 to vector<1x128xf32>
    %37 = arith.mulf %36, %1 : vector<1x128xf32>
    %c2_20 = arith.constant 2 : index
    %c1_21 = arith.constant 1 : index
    %38 = memref.load %arg2[%c2_20, %c1_21] : memref<4x2xf32, #tpu.memory_space<smem>>
    %39 = vector.broadcast %38 : f32 to vector<1x128xf32>
    %40 = arith.mulf %39, %3 : vector<1x128xf32>
    %41 = arith.addf %37, %40 : vector<1x128xf32>
    %c2_22 = arith.constant 2 : index
    %42 = memref.load %arg3[%c2_22] : memref<4xf32, #tpu.memory_space<smem>>
    %43 = vector.broadcast %42 : f32 to vector<1x128xf32>
    %44 = arith.addf %41, %43 : vector<1x128xf32>
    %cst_23 = arith.constant 0.000000e+00 : f32
    %45 = vector.broadcast %cst_23 : f32 to vector<1x128xf32>
    %46 = arith.maximumf %44, %45 : vector<1x128xf32>
    %c0_24 = arith.constant 0 : index
    %c2_25 = arith.constant 2 : index
    %47 = memref.load %arg4[%c0_24, %c2_25] : memref<1x4xf32, #tpu.memory_space<smem>>
    %48 = vector.broadcast %47 : f32 to vector<1x128xf32>
    %49 = arith.mulf %48, %46 : vector<1x128xf32>
    %50 = arith.addf %34, %49 : vector<1x128xf32>
    %c3 = arith.constant 3 : index
    %c0_26 = arith.constant 0 : index
    %51 = memref.load %arg2[%c3, %c0_26] : memref<4x2xf32, #tpu.memory_space<smem>>
    %52 = vector.broadcast %51 : f32 to vector<1x128xf32>
    %53 = arith.mulf %52, %1 : vector<1x128xf32>
    %c3_27 = arith.constant 3 : index
    %c1_28 = arith.constant 1 : index
    %54 = memref.load %arg2[%c3_27, %c1_28] : memref<4x2xf32, #tpu.memory_space<smem>>
    %55 = vector.broadcast %54 : f32 to vector<1x128xf32>
    %56 = arith.mulf %55, %3 : vector<1x128xf32>
    %57 = arith.addf %53, %56 : vector<1x128xf32>
    %c3_29 = arith.constant 3 : index
    %58 = memref.load %arg3[%c3_29] : memref<4xf32, #tpu.memory_space<smem>>
    %59 = vector.broadcast %58 : f32 to vector<1x128xf32>
    %60 = arith.addf %57, %59 : vector<1x128xf32>
    %cst_30 = arith.constant 0.000000e+00 : f32
    %61 = vector.broadcast %cst_30 : f32 to vector<1x128xf32>
    %62 = arith.maximumf %60, %61 : vector<1x128xf32>
    %c0_31 = arith.constant 0 : index
    %c3_32 = arith.constant 3 : index
    %63 = memref.load %arg4[%c0_31, %c3_32] : memref<1x4xf32, #tpu.memory_space<smem>>
    %64 = vector.broadcast %63 : f32 to vector<1x128xf32>
    %65 = arith.mulf %64, %62 : vector<1x128xf32>
    %66 = arith.addf %50, %65 : vector<1x128xf32>
    %c0_33 = arith.constant 0 : index
    %67 = memref.load %arg5[%c0_33] : memref<1xf32, #tpu.memory_space<smem>>
    %68 = vector.broadcast %67 : f32 to vector<1x128xf32>
    %69 = arith.addf %66, %68 : vector<1x128xf32>
    %cst_34 = arith.constant 5.000000e-01 : f32
    %70 = vector.broadcast %cst_34 : f32 to vector<1x128xf32>
    %71 = arith.mulf %70, %69 : vector<1x128xf32>
    %72 = math.tanh %71 : vector<1x128xf32>
    %cst_35 = arith.constant 5.000000e-01 : f32
    %73 = vector.broadcast %cst_35 : f32 to vector<1x128xf32>
    %74 = arith.mulf %73, %72 : vector<1x128xf32>
    %cst_36 = arith.constant 5.000000e-01 : f32
    %75 = vector.broadcast %cst_36 : f32 to vector<1x128xf32>
    %76 = arith.addf %74, %75 : vector<1x128xf32>
    %c0_37 = arith.constant 0 : index
    %c0_38 = arith.constant 0 : index
    %77 = vector.load %arg6[%c0_37, %c0_38] : memref<1x128xf32, #tpu.memory_space<vmem>>, vector<1x128xf32>
    tpu.vector_store %arg6[%c0_37, %c0_38], %76 {strides = array<i32>} : memref<1x128xf32, #tpu.memory_space<vmem>>, vector<1x128xf32>,
    return
  }
  func.func @transform_0(%arg0: i32) -> (i32, i32, i32) {
    %c0_i32 = arith.constant 0 : i32
    %c0_i32_0 = arith.constant 0 : i32
    %c0_i32_1 = arith.constant 0 : i32
    return %c0_i32, %arg0, %c0_i32_0 : i32, i32, i32
  }
  func.func @transform_1(%arg0: i32) -> (i32, i32) {
    %c0_i32 = arith.constant 0 : i32
    %c0_i32_0 = arith.constant 0 : i32
    %c0_i32_1 = arith.constant 0 : i32
    return %c0_i32, %c0_i32_0 : i32, i32
  }
  func.func @transform_2(%arg0: i32) -> i32 {
    %c0_i32 = arith.constant 0 : i32
    %c0_i32_0 = arith.constant 0 : i32
    return %c0_i32 : i32
  }
  func.func @transform_3(%arg0: i32) -> (i32, i32) {
    %c0_i32 = arith.constant 0 : i32
    %c0_i32_0 = arith.constant 0 : i32
    %c0_i32_1 = arith.constant 0 : i32
    return %c0_i32, %c0_i32_0 : i32, i32
  }
  func.func @transform_4(%arg0: i32) -> i32 {
    %c0_i32 = arith.constant 0 : i32
    %c0_i32_0 = arith.constant 0 : i32
    return %c0_i32 : i32
  }
  func.func @transform_5(%arg0: i32) -> (i32, i32) {
    %c0_i32 = arith.constant 0 : i32
    %c0_i32_0 = arith.constant 0 : i32
    return %arg0, %c0_i32 : i32, i32
  }
}

</mosaic_0001>

<bundles_post_ra>
// kernel: tpu_custom_call.1
= control target key start
LH: loop header
LB: loop body
LE: loop exit
PB: predicated region body
PF: predicated region fallthrough
CT: control target
= control target key end

     0   :  { %11 = vsyncpa [#allocation5], 0  ;;  %s310_s0 = inlined_call_operand.vmem [shape: f32[2,1,128], index: 0, kind: input, shape index: {}]   ;;  %s311_s1 = inlined_call_operand.vmem [shape: f32[4,2], index: 1, kind: input, shape index: {}]   ;;  %s312_s2 = inlined_call_operand.vmem [shape: f32[4], index: 2, kind: input, shape index: {}]   ;;  %s313_s3 = inlined_call_operand.vmem [shape: f32[1,4], index: 3, kind: input, shape index: {}]   ;;  %s314_s4 = inlined_call_operand.<no memory space> [shape: f32[1], index: 4, kind: input, shape index: {}]   ;;  %s315_s5 = inlined_call_operand.hbm [shape: f32[1,128], index: 5, kind: output, shape index: {}]  }
   0x1   :  { %12 = vsyncpa [#allocation7], 0  ;;  %s32_s20 = sshll.u32 %s312_s2, 4  ;;  %s33_s20 = int_to_ptr.vmem [resolvable:$true] %s32_s20 }
   0x2   :  { %13 = vsyncpa [#allocation4], 0  ;;  %s22_s23 = sshll.u32 %s311_s1, 4  ;;  %s164_s24 = scalar_lea.vmem %s33_s20, 16  ;;  %s23_s23 = int_to_ptr.vmem [resolvable:$true] %s22_s23 }
   0x3   :  { %p165_p0 = scmp.ne.s32.totalorder %s33_s20, %s164_s24  ;;  %p169_p1 = scmp.lt.s32.totalorder %s33_s20, %s33_s20 }
   0x4   :  { %p170_p2 = scmp.lt.s32.totalorder %s164_s24, %s164_s24 }
   0x6   :  { %p171_p3 = por %p170_p2, %p169_p1 }
   0x8   :  { %p172_p4 = pnand %p171_p3, %p165_p0 }
   0xa   :  { %175 = shalt.err (!%p172_p4)
}
   0xb   :  { %s228_s25 = smov [#allocation6]   ;;  %s176_s26 = scalar_lea.vmem %s23_s23, 64 }
   0xc   :  { %35 = dma.vmem_to_smem %s33_s20, 16, %s228_s25, [#allocation7]  }
   0xd   :  { %p177_p5 = scmp.ne.s32.totalorder %s23_s23, %s176_s26  ;;  %p181_p6 = scmp.lt.s32.totalorder %s23_s23, %s23_s23 }
   0xe   :  { %p182_p7 = scmp.lt.s32.totalorder %s176_s26, %s176_s26 }
  0x10   :  { %p183_p8 = por %p182_p7, %p181_p6 }
  0x12   :  { %p184_p9 = pnand %p183_p8, %p177_p5 }
  0x14   :  { %187 = shalt.err (!%p184_p9)
}
  0x15   :  { %s229_s2 = smov [#allocation3]   ;;  %s42_s28 = sshll.u32 %s313_s3, 4  ;;  %s43_s28 = int_to_ptr.vmem [resolvable:$true] %s42_s28 }
  0x16   :  { %25 = dma.vmem_to_smem %s23_s23, 64, %s229_s2, [#allocation5]  }
  0x17   :  { %s188_s29 = scalar_lea.vmem %s43_s28, 16  ;;  %p193_p11 = scmp.lt.s32.totalorder %s43_s28, %s43_s28 }
  0x18   :  { %p189_p10 = scmp.ne.s32.totalorder %s43_s28, %s188_s29  ;;  %p194_p12 = scmp.lt.s32.totalorder %s188_s29, %s188_s29 }
  0x1a   :  { %p195_p13 = por %p194_p12, %p193_p11 }
  0x1c   :  { %p196_p0 = pnand %p195_p13, %p189_p10 }
  0x1e   :  { %199 = shalt.err (!%p196_p0)
}
  0x1f   :  { %s230_s30 = smov [#allocation8]  }
  0x20   :  { %45 = dma.vmem_to_smem %s43_s28, 16, %s230_s30, [#allocation7]  }
  0x21   :  { %222 = dma.done.wait [#allocation5], 64  }
  0x22   :  { %223 = vsyncadd [#allocation5], 4294967232 }
  0x23   :  { %224 = dma.done.wait [#allocation7], 32  }
  0x24   :  { %225 = vsyncadd [#allocation7], 4294967264 }
  0x25   :  { %57 = sfence }
  0x26   :  { %s61_s6 = sld [smem:[#allocation3]]  ;;  %s145_s7 = sld [smem:[#allocation3 + $0x1]]  ;;  %v58_v0 = vld [vmem:[%s310_s0] sm:$0x1]  ;;  %v144_v1 = vld [vmem:[%s310_s0 + $0x1] sm:$0x1]  ;;  %v121_v44 = vstv %s314_s4 }
  0x27   :  { %s68_s8 = sld [smem:[#allocation6]]  ;;  %s147_s3 = sld [smem:[#allocation3 + $0x81]] }
  0x28   :  { %s146_s9 = sld [smem:[#allocation3 + $0x80]]  ;;  %s271_s10 = sld [smem:[#allocation6 + $0x1]] }
  0x29   :  { %s276_s13 = sld [smem:[#allocation8]]  ;;  %s151_s17 = sld [smem:[#allocation3 + $0x101]] }
  0x2a   :  { %s150_s14 = sld [smem:[#allocation3 + $0x100]]  ;;  %s281_s18 = sld [smem:[#allocation6 + $0x2]] }
  0x2b   :  { %s154_s19 = sld [smem:[#allocation3 + $0x180]]  ;;  %s283_s20 = sld [smem:[#allocation8 + $0x1]] }
  0x2c   :  { %v62_v2 = vstv %s61_s6  ;;  %v65_v4 = vstv %s145_s7  ;;  %s155_s21 = sld [smem:[#allocation3 + $0x181]]  ;;  %s285_s22 = sld [smem:[#allocation6 + $0x3]] }
  0x2d   :  { %v63_v3 = vmul.f32 %v62_v2, %v58_v0  ;;  %v66_v5 = vmul.f32 %v144_v1, %v65_v4  ;;  %v69_v7 = vstv %s68_s8  ;;  %v79_v9 = vstv %s147_s3  ;;  %s287_s0 = sld [smem:[#allocation8 + $0x2]]  ;;  %s157_s23 = sld [smem:[#allocation8 + $0x3]] }
  0x2e   :  { %v76_v6 = vstv %s146_s9  ;;  %v80_v11 = vmul.f32 %v144_v1, %v79_v9  ;;  %v83_v13 = vstv %s271_s10  ;;  %s231_s26 = smov [#allocation9]  }
  0x2f   :  { %v77_v8 = vmul.f32 %v76_v6, %v58_v0  ;;  %v67_v10 = vadd.f32 %v66_v5, %v63_v3  ;;  %v94_v15 = vstv %s151_s17  ;;  %v73_v19 = vstv %s276_s13  ;;  %s134_s2 = sshll.u32 %s231_s26, 4  ;;  %s135_s2 = int_to_ptr.vmem [resolvable:$true] %s134_s2 }
  0x30   :  { %v91_v12 = vstv %s150_s14  ;;  %v95_v18 = vmul.f32 %v144_v1, %v94_v15  ;;  %v98_v20 = vstv %s281_s18  ;;  %s200_s1 = scalar_lea.vmem %s135_s2, 16  ;;  %s204_s27 = scalar_lea.vmem %s135_s2, 32 }
  0x31   :  { %v92_v14 = vmul.f32 %v91_v12, %v58_v0  ;;  %v70_v16 = vadd.f32 %v69_v7, %v67_v10  ;;  %v81_v17 = vadd.f32 %v80_v11, %v77_v8  ;;  %v106_v21 = vstv %s154_s19  ;;  %p201_p1 = scmp.ne.s32.totalorder %s135_s2, %s200_s1  ;;  %p205_p2 = scmp.lt.s32.totalorder %s135_s2, %s135_s2 }
  0x32   :  { %v109_v22 = vstv %s155_s21  ;;  %v107_v26 = vmul.f32 %v106_v21, %v58_v0  ;;  %v87_v27 = vstv %s283_s20  ;;  %v113_v32 = vstv %s285_s22  ;;  %p206_p3 = scmp.lt.s32.totalorder %s204_s27, %s200_s1 }
  0x33   :  { %v71_v23 = vmax.f32 %v70_v16, 0.0  ;;  %v84_v24 = vadd.f32 %v83_v13, %v81_v17  ;;  %v96_v25 = vadd.f32 %v95_v18, %v92_v14  ;;  %v110_v28 = vmul.f32 %v144_v1, %v109_v22 }
  0x34   :  { %v102_v33 = vstv %s287_s0  ;;  %v117_v40 = vstv %s157_s23  ;;  %p207_p4 = por %p206_p3, %p205_p2 }
  0x35   :  { %v74_v29 = vmul.f32 %v73_v19, %v71_v23  ;;  %v85_v30 = vmax.f32 %v84_v24, 0.0  ;;  %v99_v31 = vadd.f32 %v98_v20, %v96_v25  ;;  %v111_v34 = vadd.f32 %v110_v28, %v107_v26 }
  0x36   :  { %p208_p5 = pnand %p207_p4, %p201_p1 }
  0x37   :  { %v88_v35 = vmul.f32 %v87_v27, %v85_v30  ;;  %v100_v36 = vmax.f32 %v99_v31, 0.0  ;;  %v114_v37 = vadd.f32 %v113_v32, %v111_v34 }
  0x39   :  { %v89_v38 = vadd.f32 %v88_v35, %v74_v29  ;;  %v103_v39 = vmul.f32 %v102_v33, %v100_v36  ;;  %v115_v41 = vmax.f32 %v114_v37, 0.0 }
  0x3b   :  { %v104_v42 = vadd.f32 %v103_v39, %v89_v38  ;;  %v118_v43 = vmul.f32 %v117_v40, %v115_v41 }
  0x3d   :  { %v119_v45 = vadd.f32 %v118_v43, %v104_v42 }
  0x3f   :  { %v122_v46 = vadd.f32 %v121_v44, %v119_v45 }
  0x41   :  { %v123_v47 = vmul.f32 0.5, %v122_v46 }
  0x43   :  { %162 = vtanh.f32 %v123_v47 }
  0x4d   :  { %v163_v48 = vpop.eup %162 }
  0x4e   :  { %v125_v49 = vmul.f32 0.5, %v163_v48 }
  0x50   :  { %v126_v50 = vadd.f32 0.5, %v125_v49 }
  0x52   :  { %127 = vst [vmem:[#allocation9] sm:$0x1] %v126_v50 }
  0x53   :  { %211 = shalt.err (!%p208_p5)
}
  0x54   :  { %s212_s29 = scalar_lea.hbm %s315_s5, 16 }
  0x55   :  { %p213_p6 = scmp.ne.s32.totalorder %s315_s5, %s212_s29  ;;  %p216_p7 = scmp.lt.u32.totalorder %s212_s29, %s315_s5 }
  0x57   :  { %p218_p8 = pnand %p216_p7, %p213_p6 }
  0x59   :  { %221 = shalt.err (!%p218_p8)
}
  0x5a   :  { %137 = dma.vmem_to_hbm [thread:$0]  %s135_s2, 16, %s315_s5, [#allocation4]  }
  0x5b   :  { %226 = dma.done.wait [#allocation4], 16  }
  0x5c   :  { %227 = vsyncadd [#allocation4], 4294967280 }
  0x5d   :  { %141 = vsyncpa [#allocation4], 1 }
  0x5e   :  { %142 = vsyncpa [#allocation5], 1 }
  0x5f   :  { %143 = vsyncpa [#allocation7], 1 }

</bundles_post_ra>
